<compile_context>
chip_gen: v7x
topology: tpu7x:2x2x1
jax: 0.10.0
libtpu: 0.0.40
codegen_flags: <defaults>
</compile_context>

<pallas_src>
import functools

import jax
import jax.numpy as jnp
from jax import lax
from jax.experimental import pallas as pl
from jax.experimental.pallas import tpu as pltpu

LANES = 128      # vreg lane width
SUBLANES = 8     # f32 sublanes per vreg
CHUNK = 128      # rows per inner accumulation chunk (multiple of 32 -> valid tile for f32/bf16/int8)
CORE_SPLIT = 2   # leading "parallel" grid axis (v7x: 2 TensorCores; serial loop of 2 elsewhere)


def _round_up(x, m):
    return ((x + m - 1) // m) * m


def _quartic_partial_kernel(pred_ref, actual_ref, out_ref, *,
                            rows, rt, steps_per_core):
    """Accumulate sum((pred - actual)^4) of this core's rows into out_ref[0] (8,128)."""
    c = pl.program_id(0)          # core-split index ("parallel")
    i = pl.program_id(1)          # per-core step    ("arbitrary" / reduction)

    @pl.when(i == 0)
    def _init():
        out_ref[...] = jnp.zeros_like(out_ref)

    # Nominal (unclamped) first row of this block, used for tail masking.
    block_start = (c * steps_per_core + i) * rt
    row_iota = lax.broadcasted_iota(jnp.int32, (CHUNK, LANES), 0)

    num_chunks = rt // CHUNK

    def body(j, acc):
        r0 = pl.multiple_of(j * CHUNK, CHUNK)
        p = pred_ref[pl.ds(r0, CHUNK), :].astype(jnp.float32)
        a = actual_ref[pl.ds(r0, CHUNK), :].astype(jnp.float32)
        # Zero rows past the real row count (partial last block, padding, or a
        # clamped duplicate block on the idle half of the core split).
        valid = (row_iota + (block_start + r0)) < rows
        d = jnp.where(valid, p - a, 0.0)
        d2 = d * d
        d4 = d2 * d2
        # Fold the chunk into an (8,128) partial sum: pure VPU adds, no XLU.
        return acc + jnp.sum(d4.reshape(CHUNK // SUBLANES, SUBLANES, LANES), axis=0)

    acc = lax.fori_loop(0, num_chunks, body,
                        jnp.zeros((SUBLANES, LANES), jnp.float32),
                        unroll=min(4, num_chunks))
    out_ref[0] += acc


def quartic_loss(pred, actual, *, row_tile_bytes=2 * 1024 * 1024):
    """mean((pred - actual)**4) over all elements, computed on TPU via Pallas.

    row_tile_bytes is the per-input bytes streamed per grid step (~2 MiB default;
    raise to ~4 MiB on v7x for a few extra % of roofline).
    """
    assert pred.shape == actual.shape, (pred.shape, actual.shape)
    n_total = pred.size
    assert n_total > 0
    itemsize = max(pred.dtype.itemsize, actual.dtype.itemsize)

    p = pred.reshape(-1)
    a = actual.reshape(-1)

    # Single (usually no-op) pad so the flat length maps onto full 128-lane rows.
    padded_len = _round_up(n_total, LANES)
    if padded_len != n_total:
        p = jnp.pad(p, (0, padded_len - n_total))
        a = jnp.pad(a, (0, padded_len - n_total))
    rows = padded_len // LANES

    # Dtype-scaled row tile keeping ~row_tile_bytes per input per step.
    base_rows = max(CHUNK, (row_tile_bytes // (LANES * itemsize)) // CHUNK * CHUNK)

    p2 = p.reshape(rows, LANES)
    a2 = a.reshape(rows, LANES)

    if rows >= base_rows:
        # Large input: full-size tile, NO row-padding pass over the inputs.
        # The tail is zeroed in-kernel by the row mask.
        rt = base_rows
        rows_padded = rows
    else:
        # Input smaller than one tile: shrink the tile to the row count and pad
        # to a CHUNK multiple (tiny copy; the whole array is < row_tile_bytes).
        rt = _round_up(rows, CHUNK)
        rows_padded = rt
        p2 = jnp.pad(p2, ((0, rows_padded - rows), (0, 0)))
        a2 = jnp.pad(a2, ((0, rows_padded - rows), (0, 0)))

    n_blocks = pl.cdiv(rows_padded, rt)
    steps_per_core = pl.cdiv(n_blocks, CORE_SPLIT)
    last_block = n_blocks - 1

    def in_map(c, i):
        # Clamp so every DMA stays inside the array (an over-shot core re-reads
        # the last block, which the in-kernel mask zeroes out).
        return (jnp.minimum(c * steps_per_core + i, last_block), 0)

    kernel = functools.partial(
        _quartic_partial_kernel, rows=rows, rt=rt, steps_per_core=steps_per_core)

    partials = pl.pallas_call(
        kernel,
        out_shape=jax.ShapeDtypeStruct((CORE_SPLIT, SUBLANES, LANES), jnp.float32),
        grid_spec=pltpu.PrefetchScalarGridSpec(
            num_scalar_prefetch=0,
            grid=(CORE_SPLIT, steps_per_core),
            in_specs=[
                pl.BlockSpec((rt, LANES), in_map),
                pl.BlockSpec((rt, LANES), in_map),
            ],
            out_specs=pl.BlockSpec((1, SUBLANES, LANES), lambda c, i: (c, 0, 0)),
        ),
        compiler_params=pltpu.CompilerParams(
            dimension_semantics=("parallel", "arbitrary"),
            vmem_limit_bytes=32 * 1024 * 1024,
        ),
    )(p2, a2)

    # Final cross-lane reduce + normalization in the wrapper (lane-dense output).
    return jnp.sum(partials) / n_total


if __name__ == "__main__":
    key = jax.random.PRNGKey(0)
    k1, k2, k3, k4 = jax.random.split(key, 4)

    # Primary small case consistent with a regression output, e.g. (B, C, H, W).
    shape = (2, 4, 16, 16)  # 2048 elements
    pred = jax.random.uniform(k1, shape, jnp.float32, minval=-2.0, maxval=2.0)
    actual = jax.random.uniform(k2, shape, jnp.float32, minval=-2.0, maxval=2.0)

    loss = jax.block_until_ready(quartic_loss(pred, actual))
    ref = jnp.mean((pred - actual) ** 4)
    assert jnp.allclose(loss, ref, rtol=1e-5, atol=1e-6), (loss, ref)

    # Secondary check: non-128-aligned element count, multi-block + tail-mask path.
    shape2 = (5, 150001)  # 750005 elements -> 2 row blocks at rt=4096, ragged tail
    pred2 = jax.random.uniform(k3, shape2, jnp.float32, minval=-2.0, maxval=2.0)
    actual2 = jax.random.uniform(k4, shape2, jnp.float32, minval=-2.0, maxval=2.0)

    loss2 = jax.block_until_ready(quartic_loss(pred2, actual2))
    ref2 = jnp.mean((pred2 - actual2) ** 4)
    assert jnp.allclose(loss2, ref2, rtol=1e-4, atol=1e-6), (loss2, ref2)

    print("KERNEL_OK")
</pallas_src>

<mosaic_0001>
module attributes {stable_mosaic.version = 11 : i64} {
  func.func @_quartic_partial_kernel(%arg0: i32, %arg1: i32, %arg2: memref<128x128xf32, #tpu.memory_space<vmem>>, %arg3: memref<128x128xf32, #tpu.memory_space<vmem>>, %arg4: memref<1x8x128xf32, #tpu.memory_space<vmem>>) attributes {dimension_semantics = [#tpu.dimension_semantics<parallel>, #tpu.dimension_semantics<arbitrary>], iteration_bounds = array<i64: 2, 1>, scalar_prefetch = 0 : i64, scratch_operands = 0 : i64, tpu.core_type = #tpu.core_type<tc>, window_params = [{transform_indices = @transform_0, window_bounds = array<i64: 128, 128>}, {transform_indices = @transform_1, window_bounds = array<i64: 128, 128>}, {transform_indices = @transform_2, window_bounds = array<i64: 1, 8, 128>}]} {
    %c0_i32 = arith.constant 0 : i32
    %0 = arith.cmpi eq, %arg1, %c0_i32 : i32
    %1 = arith.extui %0 : i1 to i32
    %c0_i32_0 = arith.constant 0 : i32
    %2 = arith.cmpi ne, %1, %c0_i32_0 : i32
    scf.if %2 {
      %cst_13 = arith.constant 0.000000e+00 : f32
      %33 = vector.broadcast %cst_13 : f32 to vector<1x8x128xf32>
      %c0_14 = arith.constant 0 : index
      %c0_15 = arith.constant 0 : index
      %c0_16 = arith.constant 0 : index
      %34 = vector.load %arg4[%c0_14, %c0_15, %c0_16] : memref<1x8x128xf32, #tpu.memory_space<vmem>>, vector<1x8x128xf32>
      tpu.vector_store %arg4[%c0_14, %c0_15, %c0_16], %33 {strides = array<i32>} : memref<1x8x128xf32, #tpu.memory_space<vmem>>, vector<1x8x128xf32>,
    } else {
    }
    %c1_i32 = arith.constant 1 : i32
    %3 = arith.muli %arg0, %c1_i32 : i32
    %4 = arith.addi %3, %arg1 : i32
    %c128_i32 = arith.constant 128 : i32
    %5 = arith.muli %4, %c128_i32 : i32
    %6 = tpu.iota {dimensions = array<i32: 0>} : vector<128x128xi32>
    %cst = arith.constant 0.000000e+00 : f32
    %7 = vector.broadcast %cst : f32 to vector<8x128xf32>
    %c0_i32_1 = arith.constant 0 : i32
    %c128_i32_2 = arith.constant 128 : i32
    %8 = arith.muli %c0_i32_1, %c128_i32_2 : i32
    %9 = tpu.assume_multiple %8, 128 : i32
    %10 = arith.index_cast %9 : i32 to index
    %c0 = arith.constant 0 : index
    %11 = vector.load %arg2[%10, %c0] : memref<128x128xf32, #tpu.memory_space<vmem>>, vector<128x128xf32>
    %12 = arith.index_cast %9 : i32 to index
    %c0_3 = arith.constant 0 : index
    %13 = vector.load %arg3[%12, %c0_3] : memref<128x128xf32, #tpu.memory_space<vmem>>, vector<128x128xf32>
    %14 = arith.addi %5, %9 : i32
    %15 = vector.broadcast %14 : i32 to vector<128x128xi32>
    %16 = arith.addi %6, %15 : vector<128x128xi32>
    %c16_i32 = arith.constant 16 : i32
    %17 = vector.broadcast %c16_i32 : i32 to vector<128x128xi32>
    %18 = arith.cmpi slt, %16, %17 : vector<128x128xi32>
    %19 = arith.subf %11, %13 : vector<128x128xf32>
    %cst_4 = arith.constant 0.000000e+00 : f32
    %20 = vector.broadcast %cst_4 : f32 to vector<128x128xf32>
    %21 = arith.select %18, %19, %20 : vector<128x128xi1>, vector<128x128xf32>
    %22 = arith.mulf %21, %21 : vector<128x128xf32>
    %23 = arith.mulf %22, %22 : vector<128x128xf32>
    %24 = vector.shape_cast %23 : vector<128x128xf32> to vector<16x8x128xf32>
    %cst_5 = arith.constant dense<0.000000e+00> : vector<8x128xf32>
    %25 = vector.multi_reduction <add>, %24, %cst_5 [0] : vector<16x8x128xf32> to vector<8x128xf32>
    %26 = arith.addf %7, %25 : vector<8x128xf32>
    %c1_i32_6 = arith.constant 1 : i32
    %c0_7 = arith.constant 0 : index
    %c0_8 = arith.constant 0 : index
    %c0_9 = arith.constant 0 : index
    %27 = vector.load %arg4[%c0_7, %c0_8, %c0_9] : memref<1x8x128xf32, #tpu.memory_space<vmem>>, vector<1x8x128xf32>
    %28 = vector.shape_cast %27 : vector<1x8x128xf32> to vector<8x128xf32>
    %29 = arith.addf %28, %26 : vector<8x128xf32>
    %c0_10 = arith.constant 0 : index
    %c0_11 = arith.constant 0 : index
    %c0_12 = arith.constant 0 : index
    %30 = vector.load %arg4[%c0_10, %c0_11, %c0_12] : memref<1x8x128xf32, #tpu.memory_space<vmem>>, vector<1x8x128xf32>
    %31 = vector.shape_cast %30 : vector<1x8x128xf32> to vector<8x128xf32>
    %32 = vector.shape_cast %29 : vector<8x128xf32> to vector<1x8x128xf32>
    tpu.vector_store %arg4[%c0_10, %c0_11, %c0_12], %32 {strides = array<i32>} : memref<1x8x128xf32, #tpu.memory_space<vmem>>, vector<1x8x128xf32>,
    return
  }
  func.func @transform_0(%arg0: i32, %arg1: i32) -> (i32, i32) {
    %c1_i32 = arith.constant 1 : i32
    %0 = arith.muli %arg0, %c1_i32 : i32
    %1 = arith.addi %0, %arg1 : i32
    %c0_i32 = arith.constant 0 : i32
    %2 = arith.minsi %1, %c0_i32 : i32
    %c0_i32_0 = arith.constant 0 : i32
    %c0_i32_1 = arith.constant 0 : i32
    return %2, %c0_i32_0 : i32, i32
  }
  func.func @transform_1(%arg0: i32, %arg1: i32) -> (i32, i32) {
    %c1_i32 = arith.constant 1 : i32
    %0 = arith.muli %arg0, %c1_i32 : i32
    %1 = arith.addi %0, %arg1 : i32
    %c0_i32 = arith.constant 0 : i32
    %2 = arith.minsi %1, %c0_i32 : i32
    %c0_i32_0 = arith.constant 0 : i32
    %c0_i32_1 = arith.constant 0 : i32
    return %2, %c0_i32_0 : i32, i32
  }
  func.func @transform_2(%arg0: i32, %arg1: i32) -> (i32, i32, i32) {
    %c0_i32 = arith.constant 0 : i32
    %c0_i32_0 = arith.constant 0 : i32
    %c0_i32_1 = arith.constant 0 : i32
    return %arg0, %c0_i32, %c0_i32_0 : i32, i32, i32
  }
}

</mosaic_0001>

<bundles_post_ra>
// kernel: tpu_custom_call.1
= control target key start
LH: loop header
LB: loop body
LE: loop exit
PB: predicated region body
PF: predicated region fallthrough
CT: control target
= control target key end

     0   :  { %7 = vsyncpa [#allocation3], 0  ;;  %s1116_s0 = inlined_call_operand.hbm [shape: f32[128,128], index: 0, kind: input, shape index: {}]   ;;  %s1117_s1 = inlined_call_operand.hbm [shape: f32[128,128], index: 1, kind: input, shape index: {}]   ;;  %s1118_s2 = inlined_call_operand.hbm [shape: f32[2,8,128], index: 2, kind: output, shape index: {}]  }
   0x1   :  { %9 = vsyncpa [#allocation3 + $0x1], 0 }
   0x2   :  { %10 = vsyncpa [#allocation6], 0 }
   0x3   :  { %12 = vsyncpa [#allocation6 + $0x1], 0 }
   0x4   :  { %13 = vsyncpa [#allocation4], 0 }
   0x5   :  { %15 = vsyncpa [#allocation4 + $0x1], 0  ;;  %s832_s9 = smov 0   ;;  %s834_s10 = smov 0  }
   0x6   :  { %s836_s11 = smov 0   ;;  %s838_s12 = smov 0  }
   0x7   :  { %s840_s13 = smov 0   ;;  %s842_s14 = smov 0  }
   0x8   :  { %s844_s15 = smov 0   ;;  %s846_s16 = smov 0  }
   0x9 LB: > { %s528_s17 = sadd.s32 4294967295, %s810_s16   ;;  %s529_s18 = sadd.s32 4294967294, %s810_s16   ;;  %s810_s16 = sphi %s846_s16, %s21_s16   ;;  %s806_s15 = sphi %s844_s15, %s1137_s15   ;;  %s802_s14 = sphi %s842_s14, %s1136_s14   ;;  %s798_s13 = sphi %s840_s13, %s1106_s13   ;;  %s794_s12 = sphi %s838_s12, %s1135_s12   ;;  %s790_s11 = sphi %s836_s11, %s1134_s11   ;;  %s786_s10 = sphi %s834_s10, %s1133_s10   ;;  %s782_s9 = sphi %s832_s9, %s1132_s9  }
   0xa   : > { %s33_s19 = sadd.s32 1, %s806_s15  ;;  %p779_p1 = scmp.ne.s32.totalorder %s798_s13, 0 }
   0xb   : > { %p35_p0 = scmp.ge.s32.totalorder %s33_s19, 2  ;;  %p54_p2 = scmp.eq.s32.totalorder %s810_s16, 0 }
   0xc   : > { %p59_p3 = scmp.ne.s32.totalorder %s798_s13, %s794_s12  ;;  %p60_p5 = scmp.eq.s32.totalorder %s528_s17, 0 }
   0xd   : > { %s1139_s19 = smov (%p35_p0, %s33_s19), 0  ;;  %p878_p4 = por %p779_p1, %p54_p2 }
   0xe   : > { %p882_p6 = por %p60_p5, %p59_p3  ;;  %s101_s22 = ssub.s32 %s806_s15, %s1139_s19 }
   0xf   : > { %p102_p7 = scmp.eq.s32.totalorder %s101_s22, 0  ;;  %s104_s23 = sadd.s32 1, %s790_s11 }
  0x10   : > { %s1122_s21 = scalar_select %p882_p6, 1, 0 }
  0x11   : > { %s890_s24 = scalar_select %p102_p7, %s790_s11, %s104_s23  }
  0x12   : > { %p114_p8 = scmp.ne.s32.totalorder %s790_s11, %s786_s10  ;;  %p115_p9 = scmp.eq.s32.totalorder %s528_s17, 1 }
  0x13   : > { %p120_p10 = scmp.ne.s32.totalorder %s786_s10, %s782_s9  ;;  %p121_p11 = scmp.eq.s32.totalorder %s529_s18, 1 }
  0x14   : > { %p896_p12 = por %p115_p9, %p114_p8  ;;  %p566_p1 = scmp.lt.s32.totalorder %s810_s16, 2 }
  0x15   : > { %p901_p0 = por %p121_p11, %p120_p10  ;;  %s812_s27 = smov [#allocation2]  }
  0x16   : > { %s1123_s25 = scalar_select %p896_p12, 1, 0 }
  0x17   : > { %s1124_s26 = scalar_select %p901_p0, 1, 0 }
  0x18   : > { %s155_s28 = sshll.u32 %s812_s27, 4  ;;  %p908_p2 = pnand %p566_p1, %p878_p4  ;;  %s156_s28 = int_to_ptr.vmem [resolvable:$true] %s155_s28 }
  0x19   : > { %s643_s4 = scalar_lea.hbm %s1116_s0, 2048 }
  0x1a   : > { %p644_p3 = scmp.ne.s32.totalorder %s1116_s0, %s643_s4  ;;  %p645_p5 = pneg %p908_p2 }
  0x1b   : > { %p650_p8 = scmp.lt.u32.totalorder %s643_s4, %s643_s4  ;;  %p652_p9 = scmp.lt.u32.totalorder %s643_s4, %s1116_s0 }
  0x1c   : > { %p646_p7 = pnand %p645_p5, %p644_p3 }
  0x1d   : > { %p653_p10 = por %p652_p9, %p650_p8 }
  0x1e   : > { %p647_p4 = pneg %p646_p7 }
  0x20   : > { %p654_p11 = pnand %p653_p10, %p647_p4 }
  0x22   : > { %657 = shalt.err (!%p654_p11)
}
  0x23   : > { %s658_s12 = scalar_lea.vmem %s156_s28, 2048  ;;  %s665_s17 = scalar_lea.vmem %s156_s28, 4096 }
  0x24   : > { %p659_p1 = scmp.ne.s32.totalorder %s156_s28, %s658_s12  ;;  %p666_p12 = scmp.lt.s32.totalorder %s156_s28, %s156_s28 }
  0x25   : > { %p667_p6 = scmp.lt.s32.totalorder %s665_s17, %s658_s12 }
  0x26   : > { %p661_p13 = pnand %p659_p1, %p645_p5 }
  0x27   : > { %p668_p3 = por %p667_p6, %p666_p12 }
  0x28   : > { %p662_p0 = pneg %p661_p13 }
  0x2a   : > { %p669_p7 = pnand %p668_p3, %p662_p0 }
  0x2c   : > { %672 = shalt.err (!%p669_p7)
}
  0x2d   : > { %s813_s18 = smov 128   ;;  %s814_s20 = smov 8  }
  0x2e   : > { %558 = dma.hbm_to_vmem [thread:$0]  (!%p908_p2), %s1116_s0, 2048, %s156_s28, [#allocation3], %s813_s18, %s813_s18, %s814_s20  }
  0x2f   : > { %p538_p13 = scmp.ge.s32.totalorder %s810_s16, 1  ;;  %p187_p4 = scmp.lt.s32.totalorder %s810_s16, 3 }
  0x30   : > { %s815_s30 = smov [#allocation5]   ;;  %s673_s6 = scalar_lea.hbm %s1117_s1, 2048 }
  0x31   : > { %p939_p8 = pnand %p538_p13, %p187_p4  ;;  %s179_s3 = sshll.u32 %s815_s30, 4  ;;  %s180_s3 = int_to_ptr.vmem [resolvable:$true] %s179_s3 }
  0x32   : > { %p674_p6 = scmp.ne.s32.totalorder %s1117_s1, %s673_s6  ;;  %p680_p9 = scmp.lt.u32.totalorder %s673_s6, %s673_s6 }
  0x33   : > { %s1126_s27 = scalar_select %p939_p8, 1, 0 }
  0x34   : > { %p676_p12 = pnand %p674_p6, %p645_p5  ;;  %p682_p10 = scmp.lt.u32.totalorder %s673_s6, %s1117_s1 }
  0x36   : > { %p677_p0 = pneg %p676_p12  ;;  %p683_p11 = por %p682_p10, %p680_p9 }
  0x38   : > { %p684_p1 = pnand %p683_p11, %p677_p0 }
  0x3a   : > { %687 = shalt.err (!%p684_p1)
}
  0x3b   : > { %s688_s17 = scalar_lea.vmem %s180_s3, 2048  ;;  %s695_s22 = scalar_lea.vmem %s180_s3, 4096 }
  0x3c   : > { %p689_p3 = scmp.ne.s32.totalorder %s180_s3, %s688_s17  ;;  %p696_p4 = scmp.lt.s32.totalorder %s180_s3, %s180_s3 }
  0x3d   : > { %p697_p8 = scmp.lt.s32.totalorder %s695_s22, %s688_s17 }
  0x3e   : > { %p691_p7 = pnand %p689_p3, %p645_p5 }
  0x3f   : > { %p698_p6 = por %p697_p8, %p696_p4 }
  0x40   : > { %p692_p13 = pneg %p691_p7 }
  0x42   : > { %p699_p12 = pnand %p698_p6, %p692_p13 }
  0x44   : > { %702 = shalt.err (!%p699_p12)
}
  0x45   : > { %561 = dma.hbm_to_vmem [thread:$0]  (!%p908_p2), %s1117_s1, 2048, %s180_s3, [#allocation6], %s813_s18, %s813_s18, %s814_s20  }
  0x46   : > { %p1127_p0 = scmp.ne.s32.totalorder %s1126_s27, 0 }
  0x47   : > { %s193_s4 = sand.u32 (!%p1127_p0), 1, %s798_s13   ;;  %p1128_p5 = scmp.ne.s32.totalorder (!%p1127_p0), %s1122_s21, 0 }
  0x48   : > { %191 = sbr.rel (%p1127_p0) target bundleno = 143 (0x8f), region = 28  ;;  %s539_s5 = sshll.u32 (!%p1127_p0), %s193_s4, 7 }
  0x49   : > { %s194_s6 = scalar_lea.sflag (!%p1127_p0), [#allocation3], %s193_s4  ;;  %s969_s7 = scalar_lea.vmem (!%p1127_p0), [#allocation2], %s539_s5 }
  0x4f   : > { %768 = dma.done.wait (%p1128_p5), %s194_s6, 2048  }
  0x50   : > { %770 = vsyncadd (%p1128_p5), %s194_s6, 4294965248  ;;  %s203_s29 = scalar_lea.sflag [#allocation6], %s193_s4  ;;  %s975_s8 = scalar_lea.vmem [#allocation5], %s539_s5 }
  0x51   : > { %772 = dma.done.wait (%p1128_p5), %s203_s29, 2048  }
  0x52   : > { %774 = vsyncadd (%p1128_p5), %s203_s29, 4294965248  ;;  %v247_v0 = vlaneseq  ;;  %s542_s18 = sshll.u32 %s802_s14, 7  ;;  %v264_v5 = vld [vmem:[%s969_s7] sm:$0xff]  ;;  %v265_v7 = vld [vmem:[%s969_s7 + $0x8] sm:$0xff]  ;;  %s229_s21 = sand.u32 1, %s786_s10  }
  0x53   : > { %v987_v3 = vstv %s542_s18  ;;  %v280_v8 = vld [vmem:[%s975_s8] sm:$0xff]  ;;  %v281_v9 = vld [vmem:[%s975_s8 + $0x8] sm:$0xff]  ;;  %v266_v13 = vld [vmem:[%s969_s7 + $0x10] sm:$0xff]  ;;  %s541_s20 = sshll.u32 %s229_s21, 3  ;;  %s1063_s17 = scalar_lea.hbm %s1118_s2, %s542_s18 }
  0x54   : > { %v981_v1 = vshrl.u32 %v247_v0, 7  ;;  %v282_v14 = vld [vmem:[%s975_s8 + $0x10] sm:$0xff]  ;;  %v330_v16 = vsub.f32 %v264_v5, %v280_v8  ;;  %v331_v17 = vsub.f32 %v265_v7, %v281_v9  ;;  %v267_v19 = vld [vmem:[%s969_s7 + $0x18] sm:$0xff]  ;;  %v268_v24 = vld [vmem:[%s969_s7 + $0x20] sm:$0xff]  ;;  %s231_s27 = scalar_lea.vmem [#allocation7], %s541_s20  ;;  %s414_s22 = scalar_lea.sflag [#allocation4], %s229_s21 }
  0x55   : > { %v283_v20 = vld [vmem:[%s975_s8 + $0x18] sm:$0xff]  ;;  %v332_v22 = vsub.f32 %v266_v13, %v282_v14  ;;  %v284_v25 = vld [vmem:[%s975_s8 + $0x20] sm:$0xff]  ;;  %v269_v31 = vld [vmem:[%s969_s7 + $0x28] sm:$0xff]  ;;  %s427_s3 = sshll.u32 %s231_s27, 4  ;;  %p1129_p8 = scmp.ne.s32.totalorder %s1123_s25, 0  ;;  %s1065_s3 = int_to_ptr.vmem [resolvable:$true] %s427_s3 }
  0x56   : > { %v249_v2 = vadd.s32 8, %v981_v1  ;;  %v250_v4 = vadd.s32 16, %v981_v1  ;;  %v251_v6 = vadd.s32 24, %v981_v1  ;;  %v298_v10 = vadd.s32 %v987_v3, %v981_v1  ;;  %v285_v32 = vld [vmem:[%s975_s8 + $0x28] sm:$0xff]  ;;  %v270_v37 = vld [vmem:[%s969_s7 + $0x30] sm:$0xff]  ;;  %v271_v45 = vld [vmem:[%s969_s7 + $0x38] sm:$0xff] }
  0x57   : > { %v252_v12 = vadd.s32 32, %v981_v1  ;;  %v253_v18 = vadd.s32 40, %v981_v1  ;;  %v254_v23 = vadd.s32 48, %v981_v1  ;;  %v333_v27 = vsub.f32 %v267_v19, %v283_v20  ;;  %v286_v38 = vld [vmem:[%s975_s8 + $0x30] sm:$0xff]  ;;  %v287_v46 = vld [vmem:[%s975_s8 + $0x38] sm:$0xff]  ;;  %v272_v53 = vld [vmem:[%s969_s7 + $0x40] sm:$0xff] }
  0x58   : > { %v299_v11 = vadd.s32 %v987_v3, %v249_v2  ;;  %v300_v15 = vadd.s32 %v987_v3, %v250_v4  ;;  %v301_v21 = vadd.s32 %v987_v3, %v251_v6  ;;  %vm314_vm0 = vcmp.lt.s32.totalorder %v298_v10, 16  ;;  %v288_v54 = vld [vmem:[%s975_s8 + $0x40] sm:$0xff]  ;;  %v273_v61 = vld [vmem:[%s969_s7 + $0x48] sm:$0xff]  ;;  %v274_v8 = vld [vmem:[%s969_s7 + $0x50] sm:$0xff]  ;;  %s703_s23 = scalar_lea.vmem %s1065_s3, 128  ;;  %s816_s30 = smov [#allocation7]  }
  0x59   : > { %v302_v26 = vadd.s32 %v987_v3, %v252_v12  ;;  %v346_v28 = vsel %vm314_vm0, %v330_v16, 0.0  ;;  %v255_v30 = vadd.s32 56, %v981_v1  ;;  %v303_v33 = vadd.s32 %v987_v3, %v253_v18  ;;  %v289_v62 = vld [vmem:[%s975_s8 + $0x48] sm:$0xff]  ;;  %v290_v9 = vld [vmem:[%s975_s8 + $0x50] sm:$0xff]  ;;  %v291_v18 = vld [vmem:[%s975_s8 + $0x58] sm:$0xff]  ;;  %p704_p2 = scmp.ne.s32.totalorder %s1065_s3, %s703_s23  ;;  %s707_s4 = sshll.u32 %s816_s30, 4  ;;  %s708_s4 = int_to_ptr.vmem [resolvable:$false] %s707_s4 }
  0x5a   : > { %vm315_vm1 = vcmp.lt.s32.totalorder %v299_v11, 16  ;;  %vm316_vm2 = vcmp.lt.s32.totalorder %v300_v15, 16  ;;  %vm317_vm3 = vcmp.lt.s32.totalorder %v301_v21, 16  ;;  %v256_v34 = vadd.s32 64, %v981_v1  ;;  %s709_s14 = scalar_lea.vmem %s708_s4, 256  ;;  %p710_p11 = scmp.lt.s32.totalorder %s1065_s3, %s708_s4 }
  0x5b   : > { %v347_v29 = vsel %vm315_vm1, %v331_v17, 0.0  ;;  %v334_v35 = vsub.f32 %v268_v24, %v284_v25  ;;  %v348_v36 = vsel %vm316_vm2, %v332_v22, 0.0  ;;  %v304_v39 = vadd.s32 %v987_v3, %v254_v23  ;;  %v275_v17 = vld [vmem:[%s969_s7 + $0x58] sm:$0xff]  ;;  %p705_p9 = pnand %p704_p2, %p1129_p8  ;;  %p711_p1 = scmp.lt.s32.totalorder %s709_s14, %s703_s23 }
  0x5c   : > { %vm318_vm4 = vcmp.lt.s32.totalorder %v302_v26, 16  ;;  %v362_v40 = vmul.f32 %v346_v28, %v346_v28  ;;  %v363_v41 = vmul.f32 %v347_v29, %v347_v29  ;;  %v335_v42 = vsub.f32 %v269_v31, %v285_v32  ;;  %v276_v26 = vld [vmem:[%s969_s7 + $0x60] sm:$0xff] }
  0x5d   : > { %v349_v43 = vsel %vm317_vm3, %v333_v27, 0.0  ;;  %v257_v44 = vadd.s32 72, %v981_v1  ;;  %v305_v47 = vadd.s32 %v987_v3, %v255_v30  ;;  %vm319_vm5 = vcmp.lt.s32.totalorder %v303_v33, 16  ;;  %v292_v27 = vld [vmem:[%s975_s8 + $0x60] sm:$0xff]  ;;  %p706_p10 = pneg %p705_p9  ;;  %p712_p3 = por %p711_p1, %p710_p11 }
  0x5e   : > { %v364_v48 = vmul.f32 %v348_v36, %v348_v36  ;;  %v258_v49 = vadd.s32 80, %v981_v1  ;;  %v306_v50 = vadd.s32 %v987_v3, %v256_v34  ;;  %v336_v51 = vsub.f32 %v270_v37, %v286_v38  ;;  %v293_v36 = vld [vmem:[%s975_s8 + $0x68] sm:$0xff] }
  0x5f   : > { %v350_v52 = vsel %vm318_vm4, %v334_v35, 0.0  ;;  %vm320_vm6 = vcmp.lt.s32.totalorder %v304_v39, 16  ;;  %v365_v55 = vmul.f32 %v349_v43, %v349_v43  ;;  %v378_v56 = vmul.f32 %v362_v40, %v362_v40  ;;  %v277_v35 = vld [vmem:[%s969_s7 + $0x68] sm:$0xff]  ;;  %v278_v43 = vld [vmem:[%s969_s7 + $0x70] sm:$0xff]  ;;  %p713_p7 = pnand %p712_p3, %p706_p10 }
  0x60   : > { %v379_v57 = vmul.f32 %v363_v41, %v363_v41  ;;  %v259_v58 = vadd.s32 88, %v981_v1  ;;  %v337_v59 = vsub.f32 %v271_v45, %v287_v46  ;;  %v351_v60 = vsel %vm319_vm5, %v335_v42, 0.0 }
  0x61   : > { %v307_v63 = vadd.s32 %v987_v3, %v257_v44  ;;  %vm321_vm7 = vcmp.lt.s32.totalorder %v305_v47, 16  ;;  %v366_v0 = vmul.f32 %v350_v52, %v350_v52  ;;  %v380_v2 = vmul.f32 %v364_v48, %v364_v48 }
  0x62   : > { %v260_v4 = vadd.s32 96, %v981_v1  ;;  %v308_v5 = vadd.s32 %v987_v3, %v258_v49  ;;  %v338_v6 = vsub.f32 %v272_v53, %v288_v54  ;;  %v352_v7 = vsel %vm320_vm6, %v336_v51, 0.0  ;;  %v295_v51 = vld [vmem:[%s975_s8 + $0x78] sm:$0xff] }
  0x63   : > { %vm322_vm8 = vcmp.lt.s32.totalorder %v306_v50, 16  ;;  %v367_v10 = vmul.f32 %v351_v60, %v351_v60  ;;  %v381_v11 = vmul.f32 %v365_v55, %v365_v55  ;;  %v394_v12 = vadd.f32 %v379_v57, %v378_v56  ;;  %v279_v50 = vld [vmem:[%s969_s7 + $0x78] sm:$0xff] }
  0x64   : > { %v261_v13 = vadd.s32 104, %v981_v1  ;;  %v309_v14 = vadd.s32 %v987_v3, %v259_v58  ;;  %v339_v15 = vsub.f32 %v273_v61, %v289_v62  ;;  %v353_v16 = vsel %vm321_vm7, %v337_v59, 0.0 }
  0x65   : > { %vm323_vm9 = vcmp.lt.s32.totalorder %v307_v63, 16  ;;  %v368_v19 = vmul.f32 %v352_v7, %v352_v7  ;;  %v382_v20 = vmul.f32 %v366_v0, %v366_v0  ;;  %v395_v21 = vadd.f32 %v394_v12, %v380_v2 }
  0x66   : > { %v262_v22 = vadd.s32 112, %v981_v1  ;;  %v310_v23 = vadd.s32 %v987_v3, %v260_v4  ;;  %v340_v24 = vsub.f32 %v274_v8, %v290_v9  ;;  %v354_v25 = vsel %vm322_vm8, %v338_v6, 0.0 }
  0x67   : > { %vm324_vm10 = vcmp.lt.s32.totalorder %v308_v5, 16  ;;  %v369_v28 = vmul.f32 %v353_v16, %v353_v16  ;;  %v383_v29 = vmul.f32 %v367_v10, %v367_v10  ;;  %v396_v30 = vadd.f32 %v395_v21, %v381_v11 }
  0x68   : > { %v263_v31 = vadd.s32 120, %v981_v1  ;;  %v311_v32 = vadd.s32 %v987_v3, %v261_v13  ;;  %v341_v33 = vsub.f32 %v275_v17, %v291_v18  ;;  %v355_v34 = vsel %vm323_vm9, %v339_v15, 0.0  ;;  %v294_v1 = vld [vmem:[%s975_s8 + $0x70] sm:$0xff] }
  0x69   : > { %vm325_vm11 = vcmp.lt.s32.totalorder %v309_v14, 16  ;;  %v370_v37 = vmul.f32 %v354_v25, %v354_v25  ;;  %v384_v38 = vmul.f32 %v368_v19, %v368_v19  ;;  %v397_v39 = vadd.f32 %v396_v30, %v382_v20 }
  0x6a   : > { %v312_v40 = vadd.s32 %v987_v3, %v262_v22  ;;  %v342_v41 = vsub.f32 %v276_v26, %v292_v27  ;;  %v356_v42 = vsel %vm324_vm10, %v340_v24, 0.0  ;;  %vm326_vm12 = vcmp.lt.s32.totalorder %v310_v23, 16 }
  0x6b   : > { %v371_v44 = vmul.f32 %v355_v34, %v355_v34  ;;  %v385_v45 = vmul.f32 %v369_v28, %v369_v28  ;;  %v398_v46 = vadd.f32 %v397_v39, %v383_v29  ;;  %v313_v47 = vadd.s32 %v987_v3, %v263_v31 }
  0x6c   : > { %v343_v48 = vsub.f32 %v277_v35, %v293_v36  ;;  %v357_v49 = vsel %vm325_vm11, %v341_v33, 0.0  ;;  %vm327_vm13 = vcmp.lt.s32.totalorder %v311_v32, 16  ;;  %v372_v52 = vmul.f32 %v356_v42, %v356_v42 }
  0x6d   : > { %v386_v53 = vmul.f32 %v370_v37, %v370_v37  ;;  %v399_v54 = vadd.f32 %v398_v46, %v384_v38  ;;  %v344_v55 = vsub.f32 %v278_v43, %v294_v1  ;;  %v358_v56 = vsel %vm326_vm12, %v342_v41, 0.0 }
  0x6e   : > { %vm328_vm14 = vcmp.lt.s32.totalorder %v312_v40, 16  ;;  %v373_v57 = vmul.f32 %v357_v49, %v357_v49  ;;  %v387_v58 = vmul.f32 %v371_v44, %v371_v44  ;;  %v345_v60 = vsub.f32 %v279_v50, %v295_v51 }
  0x6f   : > { %v400_v59 = vadd.f32 %v399_v54, %v385_v45  ;;  %v359_v61 = vsel %vm327_vm13, %v343_v48, 0.0  ;;  %vm329_vm15 = vcmp.lt.s32.totalorder %v313_v47, 16  ;;  %v374_v62 = vmul.f32 %v358_v56, %v358_v56 }
  0x70   : > { %v388_v3 = vmul.f32 %v372_v52, %v372_v52  ;;  %v360_v0 = vsel %vm328_vm14, %v344_v55, 0.0  ;;  %v375_v2 = vmul.f32 %v359_v61, %v359_v61  ;;  %v389_v4 = vmul.f32 %v373_v57, %v373_v57 }
  0x71   : > { %v401_v63 = vadd.f32 %v400_v59, %v386_v53  ;;  %v361_v6 = vsel %vm329_vm15, %v345_v60, 0.0  ;;  %v376_v7 = vmul.f32 %v360_v0, %v360_v0  ;;  %v390_v8 = vmul.f32 %v374_v62, %v374_v62 }
  0x72   : > { %v377_v10 = vmul.f32 %v361_v6, %v361_v6  ;;  %v391_v11 = vmul.f32 %v375_v2, %v375_v2 }
  0x73   : > { %v402_v5 = vadd.f32 %v401_v63, %v387_v58  ;;  %v392_v13 = vmul.f32 %v376_v7, %v376_v7 }
  0x74   : > { %v393_v15 = vmul.f32 %v377_v10, %v377_v10 }
  0x75   : > { %v403_v9 = vadd.f32 %v402_v5, %v388_v3 }
  0x77   : > { %v404_v12 = vadd.f32 %v403_v9, %v389_v4 }
  0x79   : > { %v405_v14 = vadd.f32 %v404_v12, %v390_v8 }
  0x7b   : > { %v406_v16 = vadd.f32 %v405_v14, %v391_v11 }
  0x7d   : > { %v407_v17 = vadd.f32 %v406_v16, %v392_v13 }
  0x7f   : > { %v408_v18 = vadd.f32 %v407_v17, %v393_v15 }
  0x81   : > { %412 = vst [vmem:[%s231_s27] sm:$0xff] %v408_v18 }
  0x82   : > { %716 = shalt.err (!%p713_p7)
}
  0x83   : > { %s717_s5 = scalar_lea.hbm %s1063_s17, 128  ;;  %s721_s29 = scalar_lea.hbm %s1118_s2, 256 }
  0x84   : > { %p718_p13 = scmp.ne.s32.totalorder %s1063_s17, %s717_s5  ;;  %p722_p12 = scmp.lt.u32.totalorder %s1063_s17, %s1118_s2 }
  0x85   : > { %p723_p0 = scmp.lt.u32.totalorder %s721_s29, %s717_s5  ;;  %p725_p2 = scmp.lt.u32.totalorder %s717_s5, %s1063_s17 }
  0x86   : > { %p719_p4 = pnand %p718_p13, %p1129_p8 }
  0x87   : > { %p724_p5 = por %p723_p0, %p722_p12 }
  0x88   : > { %p720_p6 = pneg %p719_p4 }
  0x89   : > { %p726_p9 = por %p725_p2, %p724_p5 }
  0x8b   : > { %p727_p10 = pnand %p726_p9, %p720_p6 }
  0x8d   : > { %730 = shalt.err (!%p727_p10)
}
  0x8e   : > { %553 = dma.vmem_to_hbm [thread:$0]  (%p1129_p8), %s1065_s3, 128, %s1063_s17, %s414_s22  }
  0x8f PF: > { %s439_s21 = sand.u32 1, %s782_s9   ;;  %p1130_p11 = scmp.ne.s32.totalorder %s1124_s26, 0 }
  0x90   : > { %p1131_p1 = scmp.ge.s32.totalorder %s810_s16, 2  ;;  %s440_s20 = scalar_lea.sflag [#allocation4], %s439_s21 }
  0x92   : > { %p563_p3 = pnand %p1131_p1, %p1130_p11 }
  0x94   : > { %776 = dma.done.wait (!%p563_p3), %s440_s20, 128  }
  0x95   : > { %778 = vsyncadd (!%p563_p3), %s440_s20, 4294967168  ;;  %s21_s16 = sadd.s32 1, %s810_s16   ;;  %s1132_s9 = smov %s786_s10 }
  0x96   : > { %p18_p7 = scmp.ge.s32.totalorder %s21_s16, 4   ;;  %s1133_s10 = smov %s790_s11 }
  0x97   : > { %s1134_s11 = smov %s890_s24  ;;  %s1135_s12 = smov %s798_s13 }
  0x98   : > { %s1106_s13 = smov 0   ;;  %s1136_s14 = smov %s806_s15 }
  0x99   : > { %s1137_s15 = smov %s1139_s19  ;;  %20 = sbr.rel (!%p18_p7) target bundleno = 9 (0x9), region = 90 }
  0xa0   :  { %445 = vsyncpa [#allocation3], 1 }
  0xa1   :  { %447 = vsyncpa [#allocation3 + $0x1], 1 }
  0xa2   :  { %448 = vsyncpa [#allocation6], 1 }
  0xa3   :  { %450 = vsyncpa [#allocation6 + $0x1], 1 }
  0xa4   :  { %451 = vsyncpa [#allocation4], 1 }
  0xa5   :  { %453 = vsyncpa [#allocation4 + $0x1], 1 }

</bundles_post_ra>
